<compile_context>
chip_gen: v7x
topology: tpu7x:2x2x1
jax: 0.10.0
libtpu: 0.0.40
codegen_flags: <defaults>
</compile_context>

<pallas_src>
import functools

import jax
import jax.numpy as jnp
from jax import lax
from jax.experimental import pallas as pl
from jax.experimental.pallas import tpu as pltpu

_LANES = 128


def _round_up(a, b):
    return (a + b - 1) // b * b


def _sublane_multiple(dtype):
    # packed sublane multiple: f32 -> 8, bf16 -> 16, int8/bool -> 32
    return 8 * max(1, 4 // jnp.dtype(dtype).itemsize)


@functools.partial(jax.jit, static_argnums=(2, 3))
def _bce_dice_impl(x, t, step_budget_bytes, split_min_bytes):
    n, d = x.shape

    x_item = jnp.dtype(x.dtype).itemsize
    t_item = jnp.dtype(t.dtype).itemsize
    sub = max(_sublane_multiple(x.dtype), _sublane_multiple(t.dtype))

    # ---- layout: (N, R, 128) so feature rows fill the sublane axis ----------
    d_pad = _round_up(d, _LANES)
    if d_pad != d:
        # Only for lane-misaligned feature dims: pad to the next 128 multiple
        # so the (otherwise free) reshape to (N, R, 128) exists.  The padded
        # elements are masked out inside the kernel, so the value is moot.
        # TODO(synk): a fully pad-free path for lane-misaligned D would need an
        # in-kernel relayout; not worth it for a <=127-element pad.
        x = jnp.pad(x, ((0, 0), (0, d_pad - d)))
        t = jnp.pad(t, ((0, 0), (0, d_pad - d)))
    r_total = d_pad // _LANES
    x3 = x.reshape(n, r_total, _LANES)
    t3 = t.reshape(n, r_total, _LANES)

    # ---- grid sizing ---------------------------------------------------------
    # Decide splits first (it feeds block sizing).  The leading "parallel"
    # axis lets v7x's two TensorCores each own half of the reduction; on
    # single-TC chips splits=2 only costs a tiny extra partial output.
    total_bytes = n * d * (x_item + t_item)
    splits = 2 if total_bytes >= split_min_bytes else 1

    # Per-step chunk: as large as the budget allows (both inputs, one buffer).
    # Double-buffered this stays well inside the explicit vmem_limit below.
    per_row_bytes = n * _LANES * (x_item + t_item)
    r_cap = max(sub, (step_budget_bytes // per_row_bytes) // sub * sub)

    if r_total < sub:
        splits = 1
        r_block = r_total                        # block == full dim (allowed)
    else:
        r_per_split = _round_up(pl.cdiv(r_total, splits), sub)
        r_block = min(r_cap, r_per_split, (r_total // sub) * sub)

    nblocks = pl.cdiv(r_total, r_block)
    k_per_split = pl.cdiv(nblocks, splits)
    last_blk = nblocks - 1

    # ---- kernel --------------------------------------------------------------
    def kernel(x_ref, t_ref, acc_ref):
        # grid = (splits, chunks_per_split); axis 1 is the reduction axis.
        @pl.when(pl.program_id(1) == 0)
        def _():
            acc_ref[...] = jnp.zeros_like(acc_ref)

        blk = pl.program_id(0) * k_per_split + pl.program_id(1)
        row0 = blk * r_block

        xv = x_ref[...].astype(jnp.float32)      # (n, r_block, 128)
        tv = t_ref[...].astype(jnp.float32)

        def accumulate(xm, tm, m):
            # One shared transcendental: e = exp(-|x|) feeds both the stable
            # BCE-with-logits form and the sigmoid (via approx reciprocal).
            e = jnp.exp(-jnp.abs(xm))
            bce = jnp.maximum(xm, 0.0) - xm * tm + jnp.log1p(e)
            r = pl.reciprocal(1.0 + e, approx=True)
            sig = jnp.where(xm >= 0.0, r, e * r)
            inter = sig * tm
            denom = sig + tm
            if m is not None:
                bce = bce * m
                denom = denom * m                # inter is already 0 where t==0
            # Sublane-axis partial reduce only -> lane-dense accumulators;
            # the final 128-lane reduce happens once in plain JAX.
            acc_ref[0] += bce.sum(axis=1)
            acc_ref[1] += inter.sum(axis=1)
            acc_ref[2] += denom.sum(axis=1)

        # Interior blocks (the vast majority) skip the mask entirely.
        interior = (row0 + r_block) * _LANES <= d

        @pl.when(interior)
        def _():
            accumulate(xv, tv, None)

        @pl.when(jnp.logical_not(interior))
        def _():
            rows = lax.broadcasted_iota(jnp.int32, xv.shape, 1)
            lanes = lax.broadcasted_iota(jnp.int32, xv.shape, 2)
            col = (row0 + rows) * _LANES + lanes
            m = col < d
            # Zero the inputs first so tail padding can never inject NaN/Inf
            # into the transcendentals; then zero the contributions.
            accumulate(jnp.where(m, xv, 0.0), jnp.where(m, tv, 0.0),
                       m.astype(jnp.float32))

    in_spec = pl.BlockSpec(
        (n, r_block, _LANES),
        # Clamp: with splits=2 and an odd block count the last grid step is a
        # duplicate read that the in-kernel mask zeroes out.
        lambda s, k: (0, jnp.minimum(s * k_per_split + k, last_blk), 0))
    out_spec = pl.BlockSpec((3, n, _LANES), lambda s, k: (s, 0, 0))
    out_shape = jax.ShapeDtypeStruct((3 * splits, n, _LANES), jnp.float32)

    parts = pl.pallas_call(
        kernel,
        out_shape=out_shape,
        grid_spec=pltpu.PrefetchScalarGridSpec(
            num_scalar_prefetch=0,
            grid=(splits, k_per_split),
            in_specs=[in_spec, in_spec],
            out_specs=out_spec,
        ),
        compiler_params=pltpu.CompilerParams(
            dimension_semantics=("parallel", "arbitrary"),
            vmem_limit_bytes=48 * 1024 * 1024),
    )(x3, t3)

    smooth = 1e-05
    # Final (cheap) cross-split / cross-lane reductions + scalar glue in JAX.
    sums = parts.reshape(splits, 3, n, _LANES).sum(axis=(0, 3))   # (3, n)
    bce = sums[0].sum() / (n * d)                 # mean over true elements
    dice = (2.0 * sums[1] + smooth) / (sums[2] + smooth)
    dice = 1.0 - dice.sum() / n
    return 0.5 * bce + dice


def bce_dice_loss(logits, target, *, step_budget_bytes=16 * 1024 * 1024,
                  split_min_bytes=8 * 1024 * 1024):
    n = logits.shape[0]
    return _bce_dice_impl(logits.reshape(n, -1), target.reshape(n, -1),
                          step_budget_bytes, split_min_bytes)


if __name__ == "__main__":
    key = jax.random.PRNGKey(0)
    ks = jax.random.split(key, 6)

    def ref_loss(logits, target):
        n = logits.shape[0]
        x = logits.reshape(n, -1).astype(jnp.float32)
        t = target.reshape(n, -1).astype(jnp.float32)
        bce = jnp.mean(jnp.maximum(x, 0.0) - x * t +
                       jnp.log1p(jnp.exp(-jnp.abs(x))))
        s = jax.nn.sigmoid(x)
        dice = (2.0 * (s * t).sum(1) + 1e-05) / (s.sum(1) + t.sum(1) + 1e-05)
        return 0.5 * bce + (1.0 - dice.sum() / n)

    def check(logits, target, **kw):
        out = bce_dice_loss(logits, target, **kw)
        jax.block_until_ready(out)
        ref = ref_loss(logits, target)
        assert jnp.allclose(out, ref, rtol=2e-3, atol=2e-3), (out, ref)

    # 1) NCHW shape consistent with the module's forward; lane-aligned D.
    logits = jax.random.normal(ks[0], (2, 4, 16, 16), dtype=jnp.float32)
    target = (jax.random.uniform(ks[1], (2, 4, 16, 16)) > 0.5).astype(jnp.float32)
    check(logits, target)

    # 2) Feature dim NOT a lane multiple (3*10*10 = 300) -> in-kernel masking.
    logits2 = jax.random.normal(ks[2], (2, 3, 10, 10), dtype=jnp.float32)
    target2 = (jax.random.uniform(ks[3], (2, 3, 10, 10)) > 0.5).astype(jnp.float32)
    check(logits2, target2)

    # 3) Tiny budgets force the multi-chunk / 2-split / clamped-extra-block
    #    paths that large inputs would normally take, while keeping the test
    #    shape small (D = 16*136 = 2176 -> 17 sublane rows, 3 blocks of 8).
    logits3 = jax.random.normal(ks[4], (2, 1, 16, 136), dtype=jnp.float32)
    target3 = (jax.random.uniform(ks[5], (2, 1, 16, 136)) > 0.5).astype(jnp.float32)
    check(logits3, target3, step_budget_bytes=16 * 1024, split_min_bytes=1)

    print("KERNEL_OK")
</pallas_src>

<mosaic_0001>
module attributes {stable_mosaic.version = 11 : i64} {
  func.func @kernel(%arg0: i32, %arg1: i32, %arg2: memref<2x8x128xf32, #tpu.memory_space<vmem>>, %arg3: memref<2x8x128xf32, #tpu.memory_space<vmem>>, %arg4: memref<3x2x128xf32, #tpu.memory_space<vmem>>) attributes {dimension_semantics = [#tpu.dimension_semantics<parallel>, #tpu.dimension_semantics<arbitrary>], iteration_bounds = array<i64: 1, 1>, scalar_prefetch = 0 : i64, scratch_operands = 0 : i64, tpu.core_type = #tpu.core_type<tc>, window_params = [{transform_indices = @transform_0, window_bounds = array<i64: 2, 8, 128>}, {transform_indices = @transform_1, window_bounds = array<i64: 2, 8, 128>}, {transform_indices = @transform_2, window_bounds = array<i64: 3, 2, 128>}]} {
    %c0_i32 = arith.constant 0 : i32
    %0 = arith.cmpi eq, %arg1, %c0_i32 : i32
    %1 = arith.extui %0 : i1 to i32
    %c0_i32_0 = arith.constant 0 : i32
    %2 = arith.cmpi ne, %1, %c0_i32_0 : i32
    scf.if %2 {
      %cst = arith.constant 0.000000e+00 : f32
      %16 = vector.broadcast %cst : f32 to vector<3x2x128xf32>
      %c0_9 = arith.constant 0 : index
      %c0_10 = arith.constant 0 : index
      %c0_11 = arith.constant 0 : index
      %17 = vector.load %arg4[%c0_9, %c0_10, %c0_11] : memref<3x2x128xf32, #tpu.memory_space<vmem>>, vector<3x2x128xf32>
      tpu.vector_store %arg4[%c0_9, %c0_10, %c0_11], %16 {strides = array<i32>} : memref<3x2x128xf32, #tpu.memory_space<vmem>>, vector<3x2x128xf32>,
    } else {
    }
    %c1_i32 = arith.constant 1 : i32
    %3 = arith.muli %arg0, %c1_i32 : i32
    %4 = arith.addi %3, %arg1 : i32
    %c8_i32 = arith.constant 8 : i32
    %5 = arith.muli %4, %c8_i32 : i32
    %c0 = arith.constant 0 : index
    %c0_1 = arith.constant 0 : index
    %c0_2 = arith.constant 0 : index
    %6 = vector.load %arg2[%c0, %c0_1, %c0_2] : memref<2x8x128xf32, #tpu.memory_space<vmem>>, vector<2x8x128xf32>
    %c0_3 = arith.constant 0 : index
    %c0_4 = arith.constant 0 : index
    %c0_5 = arith.constant 0 : index
    %7 = vector.load %arg3[%c0_3, %c0_4, %c0_5] : memref<2x8x128xf32, #tpu.memory_space<vmem>>, vector<2x8x128xf32>
    %c8_i32_6 = arith.constant 8 : i32
    %8 = arith.addi %5, %c8_i32_6 : i32
    %c128_i32 = arith.constant 128 : i32
    %9 = arith.muli %8, %c128_i32 : i32
    %c1024_i32 = arith.constant 1024 : i32
    %10 = arith.cmpi sle, %9, %c1024_i32 : i32
    %11 = arith.extui %10 : i1 to i32
    %c0_i32_7 = arith.constant 0 : i32
    %12 = arith.cmpi ne, %11, %c0_i32_7 : i32
    scf.if %12 {
      %16 = math.absf %6 : vector<2x8x128xf32>
      %cst = arith.constant 0.000000e+00 : f32
      %17 = vector.broadcast %cst : f32 to vector<2x8x128xf32>
      %18 = arith.subf %17, %16 : vector<2x8x128xf32>
      %19 = math.exp %18 : vector<2x8x128xf32>
      %cst_9 = arith.constant 0.000000e+00 : f32
      %20 = vector.broadcast %cst_9 : f32 to vector<2x8x128xf32>
      %21 = arith.maximumf %6, %20 : vector<2x8x128xf32>
      %22 = arith.mulf %6, %7 : vector<2x8x128xf32>
      %23 = arith.subf %21, %22 : vector<2x8x128xf32>
      %24 = math.log1p %19 : vector<2x8x128xf32>
      %25 = arith.addf %23, %24 : vector<2x8x128xf32>
      %cst_10 = arith.constant 1.000000e+00 : f32
      %26 = vector.broadcast %cst_10 : f32 to vector<2x8x128xf32>
      %27 = arith.addf %26, %19 : vector<2x8x128xf32>
      %28 = tpu.reciprocal %27 {approx = true} : vector<2x8x128xf32> -> vector<2x8x128xf32>
      %cst_11 = arith.constant 0.000000e+00 : f32
      %29 = vector.broadcast %cst_11 : f32 to vector<2x8x128xf32>
      %30 = arith.cmpf oge, %6, %29 : vector<2x8x128xf32>
      %31 = arith.mulf %19, %28 : vector<2x8x128xf32>
      %32 = arith.select %30, %28, %31 : vector<2x8x128xi1>, vector<2x8x128xf32>
      %33 = arith.mulf %32, %7 : vector<2x8x128xf32>
      %34 = arith.addf %32, %7 : vector<2x8x128xf32>
      %c0_12 = arith.constant 0 : index
      %c0_13 = arith.constant 0 : index
      %c0_14 = arith.constant 0 : index
      %35 = vector.load %arg4[%c0_12, %c0_13, %c0_14] : memref<3x2x128xf32, #tpu.memory_space<vmem>>, vector<1x2x128xf32>
      %36 = vector.shape_cast %35 : vector<1x2x128xf32> to vector<2x128xf32>
      %cst_15 = arith.constant dense<0.000000e+00> : vector<2x128xf32>
      %37 = vector.multi_reduction <add>, %25, %cst_15 [1] : vector<2x8x128xf32> to vector<2x128xf32>
      %38 = arith.addf %36, %37 : vector<2x128xf32>
      %c0_16 = arith.constant 0 : index
      %c0_17 = arith.constant 0 : index
      %c0_18 = arith.constant 0 : index
      %39 = vector.load %arg4[%c0_16, %c0_17, %c0_18] : memref<3x2x128xf32, #tpu.memory_space<vmem>>, vector<1x2x128xf32>
      %40 = vector.shape_cast %39 : vector<1x2x128xf32> to vector<2x128xf32>
      %41 = vector.shape_cast %38 : vector<2x128xf32> to vector<1x2x128xf32>
      tpu.vector_store %arg4[%c0_16, %c0_17, %c0_18], %41 {strides = array<i32>} : memref<3x2x128xf32, #tpu.memory_space<vmem>>, vector<1x2x128xf32>,
      %c1 = arith.constant 1 : index
      %c0_19 = arith.constant 0 : index
      %c0_20 = arith.constant 0 : index
      %42 = vector.load %arg4[%c1, %c0_19, %c0_20] : memref<3x2x128xf32, #tpu.memory_space<vmem>>, vector<1x2x128xf32>
      %43 = vector.shape_cast %42 : vector<1x2x128xf32> to vector<2x128xf32>
      %cst_21 = arith.constant dense<0.000000e+00> : vector<2x128xf32>
      %44 = vector.multi_reduction <add>, %33, %cst_21 [1] : vector<2x8x128xf32> to vector<2x128xf32>
      %45 = arith.addf %43, %44 : vector<2x128xf32>
      %c1_22 = arith.constant 1 : index
      %c0_23 = arith.constant 0 : index
      %c0_24 = arith.constant 0 : index
      %46 = vector.load %arg4[%c1_22, %c0_23, %c0_24] : memref<3x2x128xf32, #tpu.memory_space<vmem>>, vector<1x2x128xf32>
      %47 = vector.shape_cast %46 : vector<1x2x128xf32> to vector<2x128xf32>
      %48 = vector.shape_cast %45 : vector<2x128xf32> to vector<1x2x128xf32>
      tpu.vector_store %arg4[%c1_22, %c0_23, %c0_24], %48 {strides = array<i32>} : memref<3x2x128xf32, #tpu.memory_space<vmem>>, vector<1x2x128xf32>,
      %c2 = arith.constant 2 : index
      %c0_25 = arith.constant 0 : index
      %c0_26 = arith.constant 0 : index
      %49 = vector.load %arg4[%c2, %c0_25, %c0_26] : memref<3x2x128xf32, #tpu.memory_space<vmem>>, vector<1x2x128xf32>
      %50 = vector.shape_cast %49 : vector<1x2x128xf32> to vector<2x128xf32>
      %cst_27 = arith.constant dense<0.000000e+00> : vector<2x128xf32>
      %51 = vector.multi_reduction <add>, %34, %cst_27 [1] : vector<2x8x128xf32> to vector<2x128xf32>
      %52 = arith.addf %50, %51 : vector<2x128xf32>
      %c2_28 = arith.constant 2 : index
      %c0_29 = arith.constant 0 : index
      %c0_30 = arith.constant 0 : index
      %53 = vector.load %arg4[%c2_28, %c0_29, %c0_30] : memref<3x2x128xf32, #tpu.memory_space<vmem>>, vector<1x2x128xf32>
      %54 = vector.shape_cast %53 : vector<1x2x128xf32> to vector<2x128xf32>
      %55 = vector.shape_cast %52 : vector<2x128xf32> to vector<1x2x128xf32>
      tpu.vector_store %arg4[%c2_28, %c0_29, %c0_30], %55 {strides = array<i32>} : memref<3x2x128xf32, #tpu.memory_space<vmem>>, vector<1x2x128xf32>,
    } else {
    }
    %true = arith.constant true
    %13 = arith.xori %10, %true : i1
    %14 = arith.extui %13 : i1 to i32
    %c0_i32_8 = arith.constant 0 : i32
    %15 = arith.cmpi ne, %14, %c0_i32_8 : i32
    scf.if %15 {
      %16 = tpu.iota {dimensions = array<i32: 1>} : vector<2x8x128xi32>
      %17 = tpu.iota {dimensions = array<i32: 2>} : vector<2x8x128xi32>
      %18 = vector.broadcast %5 : i32 to vector<2x8x128xi32>
      %19 = arith.addi %18, %16 : vector<2x8x128xi32>
      %c128_i32_9 = arith.constant 128 : i32
      %20 = vector.broadcast %c128_i32_9 : i32 to vector<2x8x128xi32>
      %21 = arith.muli %19, %20 : vector<2x8x128xi32>
      %22 = arith.addi %21, %17 : vector<2x8x128xi32>
      %c1024_i32_10 = arith.constant 1024 : i32
      %23 = vector.broadcast %c1024_i32_10 : i32 to vector<2x8x128xi32>
      %24 = arith.cmpi slt, %22, %23 : vector<2x8x128xi32>
      %cst = arith.constant 0.000000e+00 : f32
      %25 = vector.broadcast %cst : f32 to vector<2x8x128xf32>
      %26 = arith.select %24, %6, %25 : vector<2x8x128xi1>, vector<2x8x128xf32>
      %cst_11 = arith.constant 0.000000e+00 : f32
      %27 = vector.broadcast %cst_11 : f32 to vector<2x8x128xf32>
      %28 = arith.select %24, %7, %27 : vector<2x8x128xi1>, vector<2x8x128xf32>
      %29 = arith.extui %24 : vector<2x8x128xi1> to vector<2x8x128xi32>
      %30 = arith.sitofp %29 : vector<2x8x128xi32> to vector<2x8x128xf32>
      %31 = math.absf %26 : vector<2x8x128xf32>
      %cst_12 = arith.constant 0.000000e+00 : f32
      %32 = vector.broadcast %cst_12 : f32 to vector<2x8x128xf32>
      %33 = arith.subf %32, %31 : vector<2x8x128xf32>
      %34 = math.exp %33 : vector<2x8x128xf32>
      %cst_13 = arith.constant 0.000000e+00 : f32
      %35 = vector.broadcast %cst_13 : f32 to vector<2x8x128xf32>
      %36 = arith.maximumf %26, %35 : vector<2x8x128xf32>
      %37 = arith.mulf %26, %28 : vector<2x8x128xf32>
      %38 = arith.subf %36, %37 : vector<2x8x128xf32>
      %39 = math.log1p %34 : vector<2x8x128xf32>
      %40 = arith.addf %38, %39 : vector<2x8x128xf32>
      %cst_14 = arith.constant 1.000000e+00 : f32
      %41 = vector.broadcast %cst_14 : f32 to vector<2x8x128xf32>
      %42 = arith.addf %41, %34 : vector<2x8x128xf32>
      %43 = tpu.reciprocal %42 {approx = true} : vector<2x8x128xf32> -> vector<2x8x128xf32>
      %cst_15 = arith.constant 0.000000e+00 : f32
      %44 = vector.broadcast %cst_15 : f32 to vector<2x8x128xf32>
      %45 = arith.cmpf oge, %26, %44 : vector<2x8x128xf32>
      %46 = arith.mulf %34, %43 : vector<2x8x128xf32>
      %47 = arith.select %45, %43, %46 : vector<2x8x128xi1>, vector<2x8x128xf32>
      %48 = arith.mulf %47, %28 : vector<2x8x128xf32>
      %49 = arith.addf %47, %28 : vector<2x8x128xf32>
      %50 = arith.mulf %40, %30 : vector<2x8x128xf32>
      %51 = arith.mulf %49, %30 : vector<2x8x128xf32>
      %c0_16 = arith.constant 0 : index
      %c0_17 = arith.constant 0 : index
      %c0_18 = arith.constant 0 : index
      %52 = vector.load %arg4[%c0_16, %c0_17, %c0_18] : memref<3x2x128xf32, #tpu.memory_space<vmem>>, vector<1x2x128xf32>
      %53 = vector.shape_cast %52 : vector<1x2x128xf32> to vector<2x128xf32>
      %cst_19 = arith.constant dense<0.000000e+00> : vector<2x128xf32>
      %54 = vector.multi_reduction <add>, %50, %cst_19 [1] : vector<2x8x128xf32> to vector<2x128xf32>
      %55 = arith.addf %53, %54 : vector<2x128xf32>
      %c0_20 = arith.constant 0 : index
      %c0_21 = arith.constant 0 : index
      %c0_22 = arith.constant 0 : index
      %56 = vector.load %arg4[%c0_20, %c0_21, %c0_22] : memref<3x2x128xf32, #tpu.memory_space<vmem>>, vector<1x2x128xf32>
      %57 = vector.shape_cast %56 : vector<1x2x128xf32> to vector<2x128xf32>
      %58 = vector.shape_cast %55 : vector<2x128xf32> to vector<1x2x128xf32>
      tpu.vector_store %arg4[%c0_20, %c0_21, %c0_22], %58 {strides = array<i32>} : memref<3x2x128xf32, #tpu.memory_space<vmem>>, vector<1x2x128xf32>,
      %c1 = arith.constant 1 : index
      %c0_23 = arith.constant 0 : index
      %c0_24 = arith.constant 0 : index
      %59 = vector.load %arg4[%c1, %c0_23, %c0_24] : memref<3x2x128xf32, #tpu.memory_space<vmem>>, vector<1x2x128xf32>
      %60 = vector.shape_cast %59 : vector<1x2x128xf32> to vector<2x128xf32>
      %cst_25 = arith.constant dense<0.000000e+00> : vector<2x128xf32>
      %61 = vector.multi_reduction <add>, %48, %cst_25 [1] : vector<2x8x128xf32> to vector<2x128xf32>
      %62 = arith.addf %60, %61 : vector<2x128xf32>
      %c1_26 = arith.constant 1 : index
      %c0_27 = arith.constant 0 : index
      %c0_28 = arith.constant 0 : index
      %63 = vector.load %arg4[%c1_26, %c0_27, %c0_28] : memref<3x2x128xf32, #tpu.memory_space<vmem>>, vector<1x2x128xf32>
      %64 = vector.shape_cast %63 : vector<1x2x128xf32> to vector<2x128xf32>
      %65 = vector.shape_cast %62 : vector<2x128xf32> to vector<1x2x128xf32>
      tpu.vector_store %arg4[%c1_26, %c0_27, %c0_28], %65 {strides = array<i32>} : memref<3x2x128xf32, #tpu.memory_space<vmem>>, vector<1x2x128xf32>,
      %c2 = arith.constant 2 : index
      %c0_29 = arith.constant 0 : index
      %c0_30 = arith.constant 0 : index
      %66 = vector.load %arg4[%c2, %c0_29, %c0_30] : memref<3x2x128xf32, #tpu.memory_space<vmem>>, vector<1x2x128xf32>
      %67 = vector.shape_cast %66 : vector<1x2x128xf32> to vector<2x128xf32>
      %cst_31 = arith.constant dense<0.000000e+00> : vector<2x128xf32>
      %68 = vector.multi_reduction <add>, %51, %cst_31 [1] : vector<2x8x128xf32> to vector<2x128xf32>
      %69 = arith.addf %67, %68 : vector<2x128xf32>
      %c2_32 = arith.constant 2 : index
      %c0_33 = arith.constant 0 : index
      %c0_34 = arith.constant 0 : index
      %70 = vector.load %arg4[%c2_32, %c0_33, %c0_34] : memref<3x2x128xf32, #tpu.memory_space<vmem>>, vector<1x2x128xf32>
      %71 = vector.shape_cast %70 : vector<1x2x128xf32> to vector<2x128xf32>
      %72 = vector.shape_cast %69 : vector<2x128xf32> to vector<1x2x128xf32>
      tpu.vector_store %arg4[%c2_32, %c0_33, %c0_34], %72 {strides = array<i32>} : memref<3x2x128xf32, #tpu.memory_space<vmem>>, vector<1x2x128xf32>,
    } else {
    }
    return
  }
  func.func @transform_0(%arg0: i32, %arg1: i32) -> (i32, i32, i32) {
    %c1_i32 = arith.constant 1 : i32
    %0 = arith.muli %arg0, %c1_i32 : i32
    %1 = arith.addi %0, %arg1 : i32
    %c0_i32 = arith.constant 0 : i32
    %2 = arith.minsi %1, %c0_i32 : i32
    %c0_i32_0 = arith.constant 0 : i32
    %c0_i32_1 = arith.constant 0 : i32
    %c0_i32_2 = arith.constant 0 : i32
    return %c0_i32_0, %2, %c0_i32_1 : i32, i32, i32
  }
  func.func @transform_1(%arg0: i32, %arg1: i32) -> (i32, i32, i32) {
    %c1_i32 = arith.constant 1 : i32
    %0 = arith.muli %arg0, %c1_i32 : i32
    %1 = arith.addi %0, %arg1 : i32
    %c0_i32 = arith.constant 0 : i32
    %2 = arith.minsi %1, %c0_i32 : i32
    %c0_i32_0 = arith.constant 0 : i32
    %c0_i32_1 = arith.constant 0 : i32
    %c0_i32_2 = arith.constant 0 : i32
    return %c0_i32_0, %2, %c0_i32_1 : i32, i32, i32
  }
  func.func @transform_2(%arg0: i32, %arg1: i32) -> (i32, i32, i32) {
    %c0_i32 = arith.constant 0 : i32
    %c0_i32_0 = arith.constant 0 : i32
    %c0_i32_1 = arith.constant 0 : i32
    return %arg0, %c0_i32, %c0_i32_0 : i32, i32, i32
  }
}

</mosaic_0001>

<bundles_post_ra>
// kernel: _bce_dice_impl.1
= control target key start
LH: loop header
LB: loop body
LE: loop exit
PB: predicated region body
PF: predicated region fallthrough
CT: control target
= control target key end

     0   :  { %v361_v0 = vmov 0.0   ;;  %vm147_vm4 = vcmask 1041409   ;;  %s419_s2 = inlined_call_operand.vmem [shape: f32[3,2,128], index: 2, kind: output, shape index: {}]   ;;  %s420_s0 = inlined_call_operand.vmem [shape: f32[2,8,128], index: 0, kind: input, shape index: {}]   ;;  %s421_s1 = inlined_call_operand.vmem [shape: f32[2,8,128], index: 1, kind: input, shape index: {}]  }
   0x1   :  { %69 = vst [vmem:[%s419_s2] sm:$0x3] %v361_v0  ;;  %70 = vst [vmem:[%s419_s2 + $0x2] sm:$0x3] %v361_v0  ;;  %v74_v1 = vld [vmem:[%s420_s0] sm:$0xff]  ;;  %v75_v2 = vld [vmem:[%s420_s0 + $0x8] sm:$0xff] }
   0x2   :  { %71 = vst [vmem:[%s419_s2 + $0x4] sm:$0x3] %v361_v0  ;;  %v84_v3 = vand.u32 2147483647, %v74_v1  ;;  %v85_v4 = vand.u32 2147483647, %v75_v2 }
   0x3   :  { %v76_v15 = vld [vmem:[%s421_s1] sm:$0xff]  ;;  %v77_v16 = vld [vmem:[%s421_s1 + $0x8] sm:$0xff]  ;;  %v92_v18 = vmax.f32 %v74_v1, 0.0  ;;  %v93_v22 = vmax.f32 %v75_v2, 0.0  ;;  %vm122_vm2 = vcmp.ge.f32.partialorder %v74_v1, 0.0  ;;  %vm123_vm3 = vcmp.ge.f32.partialorder %v75_v2, 0.0 }
   0x4   :  { %v86_v5 = vsub.f32 0.0, %v84_v3  ;;  %v87_v6 = vsub.f32 0.0, %v85_v4  ;;  %v94_v19 = vmul.f32 %v76_v15, %v74_v1  ;;  %v95_v23 = vmul.f32 %v77_v16, %v75_v2 }
   0x6   :  { %v88_v7 = vmul.f32 1.442695, %v86_v5  ;;  %v90_v8 = vmul.f32 1.442695, %v87_v6  ;;  %v96_v27 = vsub.f32 %v92_v18, %v94_v19  ;;  %v97_v30 = vsub.f32 %v93_v22, %v95_v23 }
   0x8   :  { %349 = vpow2.f32 %v88_v7  ;;  %v339_v19 = vld [vmem:[%s419_s2 + $0x2] sm:$0x3] }
   0x9   :  { %351 = vpow2.f32 %v90_v8 }
  0x12   :  { %v350_v9 = vpop.eup %349 }
  0x13   :  { %v352_v10 = vpop.eup %351  ;;  %v98_v11 = vadd.f32 1.0, %v350_v9  ;;  %v101_v13 = vmul.f32 -0.5, %v350_v9  ;;  %v104_v20 = vand.u32 2147483647, %v350_v9 }
  0x14   :  { %v107_v12 = vadd.f32 1.0, %v352_v10  ;;  %v110_v14 = vmul.f32 -0.5, %v352_v10  ;;  %v113_v24 = vand.u32 2147483647, %v352_v10 }
  0x15   :  { %353 = vlog2.f32 %v98_v11  ;;  %v102_v17 = vadd.f32 1.0, %v101_v13  ;;  %vm105_vm0 = vcmp.lt.f32.partialorder %v104_v20, 0.0004427343 }
  0x16   :  { %355 = vlog2.f32 %v107_v12  ;;  %v111_v21 = vadd.f32 1.0, %v110_v14  ;;  %vm114_vm1 = vcmp.lt.f32.partialorder %v113_v24, 0.0004427343 }
  0x17   :  { %357 = vrcp.f32 %v98_v11  ;;  %v103_v25 = vmul.f32 %v350_v9, %v102_v17 }
  0x18   :  { %359 = vrcp.f32 %v107_v12  ;;  %v112_v28 = vmul.f32 %v352_v10, %v111_v21  ;;  %v132_v12 = vld [vmem:[%s419_s2] sm:$0x3]  ;;  %v341_v21 = vld [vmem:[%s419_s2 + $0x4] sm:$0x3] }
  0x1f   :  { %v354_v26 = vpop.eup %353 }
  0x20   :  { %v356_v29 = vpop.eup %355  ;;  %v100_v31 = vmul.f32 0.6931472, %v354_v26 }
  0x21   :  { %v358_v32 = vpop.eup %357  ;;  %v109_v33 = vmul.f32 0.6931472, %v356_v29 }
  0x22   :  { %v360_v34 = vpop.eup %359  ;;  %v106_v35 = vsel %vm105_vm0, %v103_v25, %v100_v31  ;;  %v124_v36 = vmul.f32 %v358_v32, %v350_v9 }
  0x23   :  { %v115_v37 = vsel %vm114_vm1, %v112_v28, %v109_v33  ;;  %v116_v38 = vadd.f32 %v106_v35, %v96_v27  ;;  %v125_v39 = vmul.f32 %v360_v34, %v352_v10 }
  0x24   :  { %v117_v40 = vadd.f32 %v115_v37, %v97_v30  ;;  %v126_v41 = vsel %vm122_vm2, %v358_v32, %v124_v36 }
  0x25   :  { %v133_v42 = vrot.slane %v116_v38, 4  ;;  %v127_v43 = vsel %vm123_vm3, %v360_v34, %v125_v39  ;;  %v128_v44 = vmul.f32 %v126_v41, %v76_v15  ;;  %v130_v45 = vadd.f32 %v126_v41, %v76_v15 }
  0x26   :  { %v139_v46 = vrot.slane %v117_v40, 4  ;;  %v129_v47 = vmul.f32 %v127_v43, %v77_v16  ;;  %v131_v48 = vadd.f32 %v127_v43, %v77_v16 }
  0x27   :  { %v134_v49 = vadd.f32 %v133_v42, %v116_v38  ;;  %v154_v50 = vrot.slane %v128_v44, 4  ;;  %v174_v51 = vrot.slane %v130_v45, 4 }
  0x28   :  { %v140_v52 = vadd.f32 %v139_v46, %v117_v40  ;;  %v160_v53 = vrot.slane %v129_v47, 4  ;;  %v180_v54 = vrot.slane %v131_v48, 4 }
  0x29   :  { %v135_v55 = vrot.slane %v134_v49, 2  ;;  %v155_v56 = vadd.f32 %v154_v50, %v128_v44  ;;  %v175_v57 = vadd.f32 %v174_v51, %v130_v45 }
  0x2a   :  { %v141_v58 = vrot.slane %v140_v52, 2  ;;  %v161_v59 = vadd.f32 %v160_v53, %v129_v47  ;;  %v181_v60 = vadd.f32 %v180_v54, %v131_v48 }
  0x2b   :  { %v136_v61 = vadd.f32 %v135_v55, %v134_v49  ;;  %v156_v62 = vrot.slane %v155_v56, 2  ;;  %v176_v63 = vrot.slane %v175_v57, 2 }
  0x2c   :  { %v142_v0 = vadd.f32 %v141_v58, %v140_v52  ;;  %v162_v1 = vrot.slane %v161_v59, 2  ;;  %v182_v2 = vrot.slane %v181_v60, 2 }
  0x2d   :  { %v137_v3 = vrot.slane %v136_v61, 1  ;;  %v157_v4 = vadd.f32 %v156_v62, %v155_v56  ;;  %v177_v5 = vadd.f32 %v176_v63, %v175_v57 }
  0x2e   :  { %v143_v6 = vrot.slane %v142_v0, 1  ;;  %v163_v7 = vadd.f32 %v162_v1, %v161_v59  ;;  %v183_v8 = vadd.f32 %v182_v2, %v181_v60 }
  0x2f   :  { %v138_v9 = vadd.f32 %v137_v3, %v136_v61  ;;  %v158_v10 = vrot.slane %v157_v4, 1  ;;  %v178_v11 = vrot.slane %v177_v5, 1 }
  0x30   :  { %v144_v13 = vadd.f32 %v143_v6, %v142_v0  ;;  %v164_v14 = vrot.slane %v163_v7, 1  ;;  %v184_v15 = vrot.slane %v183_v8, 1 }
  0x31   :  { %v159_v16 = vadd.f32 %v158_v10, %v157_v4  ;;  %v179_v17 = vadd.f32 %v178_v11, %v177_v5 }
  0x32   :  { %v148_v18 = vsel %vm147_vm4, %v144_v13, %v138_v9  ;;  %v165_v20 = vadd.f32 %v164_v14, %v163_v7  ;;  %v185_v22 = vadd.f32 %v184_v15, %v183_v8 }
  0x33   :  { %v150_v23 = vadd.f32 %v148_v18, %v132_v12 }
  0x34   :  { %v168_v24 = vsel %vm147_vm4, %v165_v20, %v159_v16  ;;  %v188_v25 = vsel %vm147_vm4, %v185_v22, %v179_v17 }
  0x35   :  { %151 = vst [vmem:[%s419_s2] sm:$0x3] %v150_v23  ;;  %v170_v26 = vadd.f32 %v339_v19, %v168_v24  ;;  %v190_v27 = vadd.f32 %v341_v21, %v188_v25 }
  0x37   :  { %340 = vst [vmem:[%s419_s2 + $0x2] sm:$0x3] %v170_v26  ;;  %342 = vst [vmem:[%s419_s2 + $0x4] sm:$0x3] %v190_v27 }

</bundles_post_ra>
